<compile_context>
chip_gen: v5e
topology: v5e:2x2
jax: 0.10.0
libtpu: 0.0.40
codegen_flags: <defaults>
</compile_context>

<pallas_src>
import jax
import jax.numpy as jnp
from jax import lax
from jax.experimental import pallas as pl
from jax.experimental.pallas import tpu as pltpu


# ----------------------------------------------------------------------------
# Fused Fire-module kernel (channels-first, packed expand matmul)
# ----------------------------------------------------------------------------
def _fire_kernel(x_ref, wsq_ref, bsq_ref, wpk_ref, bcat_ref, o_ref):
    """One batch-block per grid step.

    x_ref   : (Bt, Cin, L)        f32   input block (PyTorch layout, cast in-kernel)
    wsq_ref : (sq, Cin)           bf16  squeeze 1x1 weights
    bsq_ref : (sq, 1)             f32
    wpk_ref : (e1+e3, 3*sq)       bf16  packed [expand1x1 | expand1x3 taps] weights
    bcat_ref: (e1+e3, 1)          f32   concatenated biases
    o_ref   : (Bt, e1+e3, L)      f32   output block (PyTorch layout)
    """
    Bt, _, L = x_ref.shape
    sq = wsq_ref.shape[0]

    for b in range(Bt):  # small static unroll over the batch block
        xb = x_ref[b].astype(jnp.bfloat16)                               # (Cin, L)

        # --- squeeze (1x1 conv) + ReLU, f32 accumulate / epilogue ------------
        s = jnp.dot(wsq_ref[...], xb, preferred_element_type=jnp.float32)  # (sq, L)
        s = jnp.maximum(s + bsq_ref[...], 0.0)

        # --- +-1 taps of the k=3 / pad=1 conv via lane rolls + boundary mask -
        lane = lax.broadcasted_iota(jnp.int32, (sq, L), 1)
        s_c = s.astype(jnp.bfloat16)                                       # s[l]
        s_p = jnp.where(lane == 0, 0.0,
                        pltpu.roll(s, 1, axis=1)).astype(jnp.bfloat16)     # s[l-1]
        s_n = jnp.where(lane == L - 1, 0.0,
                        pltpu.roll(s, L - 1, axis=1)).astype(jnp.bfloat16) # s[l+1]
        lhs = jnp.concatenate([s_c, s_p, s_n], axis=0)                     # (3*sq, L)

        # --- packed expand1x1 + expand1x3 + concat, then bias + ReLU ---------
        out = jnp.dot(wpk_ref[...], lhs, preferred_element_type=jnp.float32)
        out = jnp.maximum(out + bcat_ref[...], 0.0)                        # (e1+e3, L)
        o_ref[b] = out.astype(o_ref.dtype)


def fire_forward(x, params, *, batch_block=2):
    """FireModule forward. x: (N, Cin, L) float32 -> (N, e1+e3, L) float32."""
    N, Cin, L = x.shape
    w_sq, b_sq = params["squeeze"]      # (sq, Cin, 1), (sq,)
    w_e1, b_e1 = params["expand1x1"]    # (e1, sq, 1), (e1,)
    w_e3, b_e3 = params["expand1x3"]    # (e3, sq, 3), (e3,)
    sq, e1, e3 = w_sq.shape[0], w_e1.shape[0], w_e3.shape[0]
    Ctot = e1 + e3

    Bt = batch_block if (batch_block > 0 and N % batch_block == 0) else 1

    # --- weight prep (once per call; all tiny, no activation traffic) --------
    wsq = w_sq[:, :, 0].astype(jnp.bfloat16)                     # (sq, Cin)
    bsq = b_sq.reshape(sq, 1).astype(jnp.float32)

    # Packed expand weights: columns [0:sq]  multiply s   (center tap + expand1x1)
    #                        columns [sq:2sq] multiply s[l-1] (tap k=0)
    #                        columns [2sq:3sq] multiply s[l+1] (tap k=2)
    w_pack = jnp.zeros((Ctot, 3 * sq), jnp.float32)
    w_pack = w_pack.at[:e1, :sq].set(w_e1[:, :, 0])
    w_pack = w_pack.at[e1:, :sq].set(w_e3[:, :, 1])
    w_pack = w_pack.at[e1:, sq:2 * sq].set(w_e3[:, :, 0])
    w_pack = w_pack.at[e1:, 2 * sq:].set(w_e3[:, :, 2])
    w_pack = w_pack.astype(jnp.bfloat16)
    b_cat = jnp.concatenate([b_e1, b_e3]).reshape(Ctot, 1).astype(jnp.float32)

    # --- VMEM budget: double-buffered in/out blocks + weights + headroom -----
    x_blk = Bt * Cin * L * 4
    o_blk = Bt * Ctot * L * 4
    w_all = (sq * Cin + Ctot * 3 * sq) * 2 + (sq + Ctot) * 4
    vmem_limit = 2 * (x_blk + o_blk + w_all) + (4 << 20)
    vmem_limit = int(max(min(vmem_limit, 64 << 20), 32 << 20))   # cap to v7x physical

    out = pl.pallas_call(
        _fire_kernel,
        out_shape=jax.ShapeDtypeStruct((N, Ctot, L), x.dtype),
        grid=(N // Bt,),
        in_specs=[
            pl.BlockSpec((Bt, Cin, L), lambda n: (n, 0, 0)),
            pl.BlockSpec((sq, Cin), lambda n: (0, 0)),
            pl.BlockSpec((sq, 1), lambda n: (0, 0)),
            pl.BlockSpec((Ctot, 3 * sq), lambda n: (0, 0)),
            pl.BlockSpec((Ctot, 1), lambda n: (0, 0)),
        ],
        out_specs=pl.BlockSpec((Bt, Ctot, L), lambda n: (n, 0, 0)),
        compiler_params=pltpu.CompilerParams(
            dimension_semantics=("parallel",),
            vmem_limit_bytes=vmem_limit,
        ),
    )(x, wsq, bsq, w_pack, b_cat)

    return out                                                    # (N, e1+e3, L)


# ----------------------------------------------------------------------------
# Parameter init (PyTorch Conv1d-like uniform fan-in init) and pure-JAX reference
# ----------------------------------------------------------------------------
def _init_conv(key, cout, cin, k):
    kw, kb = jax.random.split(key)
    bound = 1.0 / float(cin * k) ** 0.5
    w = jax.random.uniform(kw, (cout, cin, k), jnp.float32, -bound, bound)
    b = jax.random.uniform(kb, (cout,), jnp.float32, -bound, bound)
    return w, b


def init_fire(key, in_channels, squeeze_channels, e1_channels, e3_channels):
    k1, k2, k3 = jax.random.split(key, 3)
    return {
        "squeeze": _init_conv(k1, squeeze_channels, in_channels, 1),
        "expand1x1": _init_conv(k2, e1_channels, squeeze_channels, 1),
        "expand1x3": _init_conv(k3, e3_channels, squeeze_channels, 3),
    }


def fire_reference(x, params):
    """Pure-JAX (f32) reference of the PyTorch FireModule forward."""
    w_sq, b_sq = params["squeeze"]
    w_e1, b_e1 = params["expand1x1"]
    w_e3, b_e3 = params["expand1x3"]
    N, Cin, L = x.shape

    s = jnp.einsum("ncl,oc->nol", x, w_sq[:, :, 0]) + b_sq[None, :, None]
    s = jnp.maximum(s, 0.0)

    y1 = jnp.einsum("ncl,oc->nol", s, w_e1[:, :, 0]) + b_e1[None, :, None]

    s_pad = jnp.pad(s, ((0, 0), (0, 0), (1, 1)))
    y3 = b_e3[None, :, None]
    for k in range(3):
        y3 = y3 + jnp.einsum("ncl,oc->nol", s_pad[:, :, k : k + L], w_e3[:, :, k])

    return jnp.maximum(jnp.concatenate([y1, y3], axis=1), 0.0)


# ----------------------------------------------------------------------------
if __name__ == "__main__":
    key = jax.random.PRNGKey(0)
    kp, kx = jax.random.split(key)

    # First fire block of SqueezeNet at a small, lane-dense length.
    batch, in_channels, length = 4, 96, 128
    squeeze_channels, e1_channels, e3_channels = 16, 64, 64

    params = init_fire(kp, in_channels, squeeze_channels, e1_channels, e3_channels)
    x = jax.random.normal(kx, (batch, in_channels, length), dtype=jnp.float32)

    out = jax.block_until_ready(fire_forward(x, params, batch_block=2))

    assert out.shape == (batch, e1_channels + e3_channels, length), out.shape
    assert bool(jnp.all(jnp.isfinite(out)))

    # Correctness vs f32 reference (kernel uses bf16 MXU inputs -> relative check).
    ref = fire_reference(x, params)
    abs_err = float(jnp.max(jnp.abs(out - ref)))
    rel_err = abs_err / (float(jnp.max(jnp.abs(ref))) + 1e-6)
    assert rel_err < 3e-2, f"rel err {rel_err} (abs {abs_err})"

    print("KERNEL_OK")
</pallas_src>

<mosaic_0001>
module attributes {stable_mosaic.version = 11 : i64} {
  func.func @_fire_kernel(%arg0: i32, %arg1: memref<2x96x128xf32, #tpu.memory_space<vmem>>, %arg2: memref<16x96xbf16, #tpu.memory_space<vmem>>, %arg3: memref<16x1xf32, #tpu.memory_space<vmem>>, %arg4: memref<128x48xbf16, #tpu.memory_space<vmem>>, %arg5: memref<128x1xf32, #tpu.memory_space<vmem>>, %arg6: memref<2x128x128xf32, #tpu.memory_space<vmem>>) attributes {dimension_semantics = [#tpu.dimension_semantics<parallel>], iteration_bounds = array<i64: 2>, scalar_prefetch = 0 : i64, scratch_operands = 0 : i64, tpu.core_type = #tpu.core_type<tc>, window_params = [{transform_indices = @transform_0, window_bounds = array<i64: 2, 96, 128>}, {pipeline_mode = #tpu.pipeline_mode<synchronous>, transform_indices = @transform_1, window_bounds = array<i64: 16, 96>}, {pipeline_mode = #tpu.pipeline_mode<synchronous>, transform_indices = @transform_2, window_bounds = array<i64: 16, 1>}, {pipeline_mode = #tpu.pipeline_mode<synchronous>, transform_indices = @transform_3, window_bounds = array<i64: 128, 48>}, {pipeline_mode = #tpu.pipeline_mode<synchronous>, transform_indices = @transform_4, window_bounds = array<i64: 128, 1>}, {transform_indices = @transform_5, window_bounds = array<i64: 2, 128, 128>}]} {
    %c0 = arith.constant 0 : index
    %c0_0 = arith.constant 0 : index
    %c0_1 = arith.constant 0 : index
    %0 = vector.load %arg1[%c0, %c0_0, %c0_1] : memref<2x96x128xf32, #tpu.memory_space<vmem>>, vector<1x96x128xf32>
    %1 = vector.shape_cast %0 : vector<1x96x128xf32> to vector<96x128xf32>
    %2 = arith.truncf %1 : vector<96x128xf32> to vector<96x128xbf16>
    %c0_2 = arith.constant 0 : index
    %c0_3 = arith.constant 0 : index
    %3 = vector.load %arg2[%c0_2, %c0_3] : memref<16x96xbf16, #tpu.memory_space<vmem>>, vector<16x96xbf16>
    %cst = arith.constant dense<0.000000e+00> : vector<16x128xf32>
    %4 = tpu.matmul %3, %2, %cst {dimension_numbers = #tpu.dot_dimension_numbers<[1], [0], [0], [1], [0, 0, 1, 1], [], []>} : vector<16x96xbf16>, vector<96x128xbf16>, vector<16x128xf32> -> vector<16x128xf32>
    %c0_4 = arith.constant 0 : index
    %c0_5 = arith.constant 0 : index
    %5 = vector.load %arg3[%c0_4, %c0_5] : memref<16x1xf32, #tpu.memory_space<vmem>>, vector<16x1xf32>
    %6 = vector.broadcast %5 : vector<16x1xf32> to vector<16x128xf32>
    %7 = arith.addf %4, %6 : vector<16x128xf32>
    %cst_6 = arith.constant 0.000000e+00 : f32
    %8 = vector.broadcast %cst_6 : f32 to vector<16x128xf32>
    %9 = arith.maximumf %7, %8 : vector<16x128xf32>
    %10 = tpu.iota {dimensions = array<i32: 1>} : vector<16x128xi32>
    %11 = arith.truncf %9 : vector<16x128xf32> to vector<16x128xbf16>
    %c0_i32 = arith.constant 0 : i32
    %12 = vector.broadcast %c0_i32 : i32 to vector<16x128xi32>
    %13 = arith.cmpi eq, %10, %12 : vector<16x128xi32>
    %c1_i32 = arith.constant 1 : i32
    %14 = tpu.dynamic_rotate %9 by %c1_i32 dim 1 : vector<16x128xf32>, i32 -> vector<16x128xf32>
    %cst_7 = arith.constant 0.000000e+00 : f32
    %15 = vector.broadcast %cst_7 : f32 to vector<16x128xf32>
    %16 = arith.select %13, %15, %14 : vector<16x128xi1>, vector<16x128xf32>
    %17 = arith.truncf %16 : vector<16x128xf32> to vector<16x128xbf16>
    %c127_i32 = arith.constant 127 : i32
    %18 = vector.broadcast %c127_i32 : i32 to vector<16x128xi32>
    %19 = arith.cmpi eq, %10, %18 : vector<16x128xi32>
    %c127_i32_8 = arith.constant 127 : i32
    %20 = tpu.dynamic_rotate %9 by %c127_i32_8 dim 1 : vector<16x128xf32>, i32 -> vector<16x128xf32>
    %cst_9 = arith.constant 0.000000e+00 : f32
    %21 = vector.broadcast %cst_9 : f32 to vector<16x128xf32>
    %22 = arith.select %19, %21, %20 : vector<16x128xi1>, vector<16x128xf32>
    %23 = arith.truncf %22 : vector<16x128xf32> to vector<16x128xbf16>
    %24 = tpu.concatenate %11, %17, %23 in 0 : vector<16x128xbf16>, vector<16x128xbf16>, vector<16x128xbf16> -> vector<48x128xbf16>
    %c0_10 = arith.constant 0 : index
    %c0_11 = arith.constant 0 : index
    %25 = vector.load %arg4[%c0_10, %c0_11] : memref<128x48xbf16, #tpu.memory_space<vmem>>, vector<128x48xbf16>
    %cst_12 = arith.constant dense<0.000000e+00> : vector<128x128xf32>
    %26 = tpu.matmul %25, %24, %cst_12 {dimension_numbers = #tpu.dot_dimension_numbers<[1], [0], [0], [1], [0, 0, 1, 1], [], []>} : vector<128x48xbf16>, vector<48x128xbf16>, vector<128x128xf32> -> vector<128x128xf32>
    %c0_13 = arith.constant 0 : index
    %c0_14 = arith.constant 0 : index
    %27 = vector.load %arg5[%c0_13, %c0_14] : memref<128x1xf32, #tpu.memory_space<vmem>>, vector<128x1xf32>
    %28 = vector.broadcast %27 : vector<128x1xf32> to vector<128x128xf32>
    %29 = arith.addf %26, %28 : vector<128x128xf32>
    %cst_15 = arith.constant 0.000000e+00 : f32
    %30 = vector.broadcast %cst_15 : f32 to vector<128x128xf32>
    %31 = arith.maximumf %29, %30 : vector<128x128xf32>
    %c0_16 = arith.constant 0 : index
    %c0_17 = arith.constant 0 : index
    %c0_18 = arith.constant 0 : index
    %32 = vector.load %arg6[%c0_16, %c0_17, %c0_18] : memref<2x128x128xf32, #tpu.memory_space<vmem>>, vector<1x128x128xf32>
    %33 = vector.shape_cast %32 : vector<1x128x128xf32> to vector<128x128xf32>
    %34 = vector.shape_cast %31 : vector<128x128xf32> to vector<1x128x128xf32>
    tpu.vector_store %arg6[%c0_16, %c0_17, %c0_18], %34 {strides = array<i32>} : memref<2x128x128xf32, #tpu.memory_space<vmem>>, vector<1x128x128xf32>,
    %c1 = arith.constant 1 : index
    %c0_19 = arith.constant 0 : index
    %c0_20 = arith.constant 0 : index
    %35 = vector.load %arg1[%c1, %c0_19, %c0_20] : memref<2x96x128xf32, #tpu.memory_space<vmem>>, vector<1x96x128xf32>
    %36 = vector.shape_cast %35 : vector<1x96x128xf32> to vector<96x128xf32>
    %37 = arith.truncf %36 : vector<96x128xf32> to vector<96x128xbf16>
    %c0_21 = arith.constant 0 : index
    %c0_22 = arith.constant 0 : index
    %38 = vector.load %arg2[%c0_21, %c0_22] : memref<16x96xbf16, #tpu.memory_space<vmem>>, vector<16x96xbf16>
    %cst_23 = arith.constant dense<0.000000e+00> : vector<16x128xf32>
    %39 = tpu.matmul %38, %37, %cst_23 {dimension_numbers = #tpu.dot_dimension_numbers<[1], [0], [0], [1], [0, 0, 1, 1], [], []>} : vector<16x96xbf16>, vector<96x128xbf16>, vector<16x128xf32> -> vector<16x128xf32>
    %c0_24 = arith.constant 0 : index
    %c0_25 = arith.constant 0 : index
    %40 = vector.load %arg3[%c0_24, %c0_25] : memref<16x1xf32, #tpu.memory_space<vmem>>, vector<16x1xf32>
    %41 = vector.broadcast %40 : vector<16x1xf32> to vector<16x128xf32>
    %42 = arith.addf %39, %41 : vector<16x128xf32>
    %cst_26 = arith.constant 0.000000e+00 : f32
    %43 = vector.broadcast %cst_26 : f32 to vector<16x128xf32>
    %44 = arith.maximumf %42, %43 : vector<16x128xf32>
    %45 = tpu.iota {dimensions = array<i32: 1>} : vector<16x128xi32>
    %46 = arith.truncf %44 : vector<16x128xf32> to vector<16x128xbf16>
    %c0_i32_27 = arith.constant 0 : i32
    %47 = vector.broadcast %c0_i32_27 : i32 to vector<16x128xi32>
    %48 = arith.cmpi eq, %45, %47 : vector<16x128xi32>
    %c1_i32_28 = arith.constant 1 : i32
    %49 = tpu.dynamic_rotate %44 by %c1_i32_28 dim 1 : vector<16x128xf32>, i32 -> vector<16x128xf32>
    %cst_29 = arith.constant 0.000000e+00 : f32
    %50 = vector.broadcast %cst_29 : f32 to vector<16x128xf32>
    %51 = arith.select %48, %50, %49 : vector<16x128xi1>, vector<16x128xf32>
    %52 = arith.truncf %51 : vector<16x128xf32> to vector<16x128xbf16>
    %c127_i32_30 = arith.constant 127 : i32
    %53 = vector.broadcast %c127_i32_30 : i32 to vector<16x128xi32>
    %54 = arith.cmpi eq, %45, %53 : vector<16x128xi32>
    %c127_i32_31 = arith.constant 127 : i32
    %55 = tpu.dynamic_rotate %44 by %c127_i32_31 dim 1 : vector<16x128xf32>, i32 -> vector<16x128xf32>
    %cst_32 = arith.constant 0.000000e+00 : f32
    %56 = vector.broadcast %cst_32 : f32 to vector<16x128xf32>
    %57 = arith.select %54, %56, %55 : vector<16x128xi1>, vector<16x128xf32>
    %58 = arith.truncf %57 : vector<16x128xf32> to vector<16x128xbf16>
    %59 = tpu.concatenate %46, %52, %58 in 0 : vector<16x128xbf16>, vector<16x128xbf16>, vector<16x128xbf16> -> vector<48x128xbf16>
    %c0_33 = arith.constant 0 : index
    %c0_34 = arith.constant 0 : index
    %60 = vector.load %arg4[%c0_33, %c0_34] : memref<128x48xbf16, #tpu.memory_space<vmem>>, vector<128x48xbf16>
    %cst_35 = arith.constant dense<0.000000e+00> : vector<128x128xf32>
    %61 = tpu.matmul %60, %59, %cst_35 {dimension_numbers = #tpu.dot_dimension_numbers<[1], [0], [0], [1], [0, 0, 1, 1], [], []>} : vector<128x48xbf16>, vector<48x128xbf16>, vector<128x128xf32> -> vector<128x128xf32>
    %c0_36 = arith.constant 0 : index
    %c0_37 = arith.constant 0 : index
    %62 = vector.load %arg5[%c0_36, %c0_37] : memref<128x1xf32, #tpu.memory_space<vmem>>, vector<128x1xf32>
    %63 = vector.broadcast %62 : vector<128x1xf32> to vector<128x128xf32>
    %64 = arith.addf %61, %63 : vector<128x128xf32>
    %cst_38 = arith.constant 0.000000e+00 : f32
    %65 = vector.broadcast %cst_38 : f32 to vector<128x128xf32>
    %66 = arith.maximumf %64, %65 : vector<128x128xf32>
    %c1_39 = arith.constant 1 : index
    %c0_40 = arith.constant 0 : index
    %c0_41 = arith.constant 0 : index
    %67 = vector.load %arg6[%c1_39, %c0_40, %c0_41] : memref<2x128x128xf32, #tpu.memory_space<vmem>>, vector<1x128x128xf32>
    %68 = vector.shape_cast %67 : vector<1x128x128xf32> to vector<128x128xf32>
    %69 = vector.shape_cast %66 : vector<128x128xf32> to vector<1x128x128xf32>
    tpu.vector_store %arg6[%c1_39, %c0_40, %c0_41], %69 {strides = array<i32>} : memref<2x128x128xf32, #tpu.memory_space<vmem>>, vector<1x128x128xf32>,
    return
  }
  func.func @transform_0(%arg0: i32) -> (i32, i32, i32) {
    %c0_i32 = arith.constant 0 : i32
    %c0_i32_0 = arith.constant 0 : i32
    %c0_i32_1 = arith.constant 0 : i32
    return %arg0, %c0_i32, %c0_i32_0 : i32, i32, i32
  }
  func.func @transform_1(%arg0: i32) -> (i32, i32) {
    %c0_i32 = arith.constant 0 : i32
    %c0_i32_0 = arith.constant 0 : i32
    %c0_i32_1 = arith.constant 0 : i32
    return %c0_i32, %c0_i32_0 : i32, i32
  }
  func.func @transform_2(%arg0: i32) -> (i32, i32) {
    %c0_i32 = arith.constant 0 : i32
    %c0_i32_0 = arith.constant 0 : i32
    %c0_i32_1 = arith.constant 0 : i32
    return %c0_i32, %c0_i32_0 : i32, i32
  }
  func.func @transform_3(%arg0: i32) -> (i32, i32) {
    %c0_i32 = arith.constant 0 : i32
    %c0_i32_0 = arith.constant 0 : i32
    %c0_i32_1 = arith.constant 0 : i32
    return %c0_i32, %c0_i32_0 : i32, i32
  }
  func.func @transform_4(%arg0: i32) -> (i32, i32) {
    %c0_i32 = arith.constant 0 : i32
    %c0_i32_0 = arith.constant 0 : i32
    %c0_i32_1 = arith.constant 0 : i32
    return %c0_i32, %c0_i32_0 : i32, i32
  }
  func.func @transform_5(%arg0: i32) -> (i32, i32, i32) {
    %c0_i32 = arith.constant 0 : i32
    %c0_i32_0 = arith.constant 0 : i32
    %c0_i32_1 = arith.constant 0 : i32
    return %arg0, %c0_i32, %c0_i32_0 : i32, i32, i32
  }
}

</mosaic_0001>

<bundles_post_ra>
// kernel: tpu_custom_call.1
= control target key start
LH: loop header
LB: loop body
LE: loop exit
PB: predicated region body
PF: predicated region fallthrough
CT: control target
= control target key end

     0   :  { %10 = vsyncpa [#allocation3], 0  ;;  %s1778_s0 = inlined_call_operand.hbm [shape: f32[4,96,128], index: 0, kind: input, shape index: {}]   ;;  %s1779_s1 = inlined_call_operand.vmem [shape: bf16[16,96], index: 1, kind: input, shape index: {}]   ;;  %s1780_s2 = inlined_call_operand.vmem [shape: f32[16,1], index: 2, kind: input, shape index: {}]   ;;  %s1781_s3 = inlined_call_operand.vmem [shape: bf16[128,48], index: 3, kind: input, shape index: {}]   ;;  %s1782_s4 = inlined_call_operand.vmem [shape: f32[128,1], index: 4, kind: input, shape index: {}]   ;;  %s1783_s5 = inlined_call_operand.hbm [shape: f32[4,128,128], index: 5, kind: output, shape index: {}]  }
   0x1   :  { %12 = vsyncpa [#allocation3 + $0x1], 0 }
   0x2   :  { %13 = vsyncpa [#allocation4], 0 }
   0x3   :  { %15 = vsyncpa [#allocation4 + $0x1], 0  ;;  %s1417_s18 = smov 0   ;;  %s1419_s19 = smov 0  }
   0x4   :  { %s1421_s20 = smov 0   ;;  %s1423_s21 = smov 0  }
   0x5 LB: > { %s1438_s22 = sadd.s32 4294967295, %s1378_s21   ;;  %s1045_s23 = sadd.s32 4294967294, %s1378_s21   ;;  %s1378_s21 = sphi %s1423_s21, %s1791_s21   ;;  %s1374_s20 = sphi %s1421_s20, %s1790_s20   ;;  %s1370_s19 = sphi %s1419_s19, %s1789_s19   ;;  %s1366_s18 = sphi %s1417_s18, %s1788_s18  }
   0x6   : > { %s1442_s24 = sadd.s32 1, %s1378_s21   ;;  %s28_s25 = sadd.s32 1, %s1374_s20 }
   0x7   : > { %s25_s26 = ssub.s32 %s1378_s21, %s1442_s24  ;;  %p35_p0 = scmp.ne.s32.totalorder %s1374_s20, %s1370_s19 }
   0x8   : > { %p26_p1 = scmp.eq.s32.totalorder %s25_s26, 0  ;;  %p36_p2 = scmp.eq.s32.totalorder %s1378_s21, 0 }
   0x9   : > { %p41_p3 = scmp.ne.s32.totalorder %s1370_s19, %s1366_s18  ;;  %p42_p4 = scmp.eq.s32.totalorder %s1438_s22, 0 }
   0xa   : > { %s1454_s27 = scalar_select %p26_p1, %s1374_s20, %s28_s25  }
   0xb   : > { %p37_p5 = por %p36_p2, %p35_p0  ;;  %p1456_p6 = por %p42_p4, %p41_p3 }
   0xc   : > { %p149_p7 = scmp.eq.s32.totalorder %s1438_s22, 1  ;;  %p155_p8 = scmp.eq.s32.totalorder %s1045_s23, 1 }
   0xd   : > { %p1047_p9 = scmp.ge.s32.totalorder %s1378_s21, 2  ;;  %p1218_p10 = scmp.lt.s32.totalorder %s1378_s21, 2 }
   0xe   : > { %p1463_p11 = por %p149_p7, %p35_p0  ;;  %p1467_p12 = por %p155_p8, %p41_p3 }
   0xf   : > { %s187_s6 = sand.u32 1, %s1374_s20   ;;  %s1204_s7 = smul.u32 192, %s1378_s21 }
  0x10   : > { %s1203_s8 = smul.u32 192, %s187_s6  ;;  %p1476_p13 = pnand %p1218_p10, %p37_p5 }
  0x11   : > { %s197_s11 = scalar_lea.hbm %s1778_s0, %s1204_s7  ;;  %s188_s16 = scalar_lea.sflag [#allocation3], %s187_s6 }
  0x12   : > { %s198_s13 = sshll.u32 %s197_s11, 4  ;;  %s191_s14 = scalar_lea.vmem [#allocation2], %s1203_s8  ;;  %s199_s13 = int_to_ptr.hbm [resolvable:$true] %s198_s13 }
  0x13   : > { %s200_s15 = sshll.u32 %s191_s14, 4  ;;  %s1282_s17 = sshra.s32 %s199_s13, 4  ;;  %s201_s15 = int_to_ptr.vmem [resolvable:$true] %s200_s15  ;;  %s1283_s17 = int_to_ptr.hbm [resolvable:$true] %s1282_s17 }
  0x14   : > { %s1284_s23 = scalar_lea.hbm %s1283_s17, 192  ;;  %p1286_p1 = pneg %p1476_p13 }
  0x15   : > { %p1285_p0 = scmp.ne.s32.totalorder %s1283_s17, %s1284_s23  ;;  %s1289_s7 = scalar_lea.hbm %s1778_s0, 384 }
  0x16   : > { %p1290_p4 = scmp.lt.s32.totalorder %s1283_s17, %s1778_s0  ;;  %p1291_p5 = scmp.lt.s32.totalorder %s1289_s7, %s1284_s23 }
  0x17   : > { %p1287_p2 = pnand %p1286_p1, %p1285_p0 }
  0x18   : > { %p1292_p7 = por %p1291_p5, %p1290_p4 }
  0x19   : > { %p1288_p3 = pneg %p1287_p2 }
  0x1b   : > { %p1293_p8 = pnand %p1292_p7, %p1288_p3 }
  0x1d   : > { %1296 = shalt.err (!%p1293_p8)
}
  0x1e   : > { %s1380_s6 = smov 128   ;;  %s1381_s8 = smov 8  }
  0x1f   : > { %1213 = dma.hbm_to_vmem [thread:$0]  (!%p1476_p13), %s199_s13, 3072, %s201_s15, %s188_s16, %s1380_s6, %s1380_s6, %s1381_s8  }
  0x20   : > { %p1051_p10 = scmp.ge.s32.totalorder %s1378_s21, 1  ;;  %p208_p0 = scmp.lt.s32.totalorder %s1378_s21, 3 }
  0x22   : > { %p209_p1 = pnand %p1051_p10, %p208_p0 }
  0x23   : > { %s1493_s11 = sand.u32 (!%p209_p1), 1, %s1370_s19  }
  0x24   : > { %212 = sbr.rel (%p209_p1) target bundleno = 549 (0x225), region = 40  ;;  %s215_s17 = scalar_lea.sflag (!%p209_p1), [#allocation3], %s1493_s11 }
  0x25   : > { %s1205_s14 = smul.u32 (!%p209_p1), 192, %s1493_s11 }
  0x27   : > { %s1497_s23 = scalar_lea.vmem (!%p209_p1), [#allocation2], %s1205_s14 }
  0x29   : > { %1357 = dma.done.wait (%p1456_p6), %s215_s17, 3072  }
  0x2a   : > { %1359 = vsyncadd (%p1456_p6), %s215_s17, 4294964224  ;;  %v1382_v0 = vmov 0   ;;  %v259_v1 = vld [vmem:[%s1497_s23 + $0x50] sm:$0xff]  ;;  %v260_v2 = vld [vmem:[%s1497_s23 + $0x58] sm:$0xff]  ;;  %vm286_vm0 = vcmask 785408   ;;  %s1383_s9 = smov 1  }
  0x2b   : > { %1260 = vset.pattern.permute.xlu1 %v1382_v0  ;;  %1259 = vset.pattern.permute.xlu0 %v1382_v0  ;;  %v1108_v3 = vld [vmem:[%s1497_s23 + $0xb0] sm:$0xff]  ;;  %v266_v4 = vpack.c.bf16 %v260_v2, %v259_v1  ;;  %v1109_v5 = vld [vmem:[%s1497_s23 + $0xb8] sm:$0xff]  ;;  %v257_v6 = vld [vmem:[%s1497_s23 + $0x40] sm:$0xff]  ;;  %s1384_s10 = smov 127   ;;  %vm498_vm3 = vcmask 392192   ;;  %s1196_s12 = sshll.u32 %s1438_s22, 8 }
  0x2c   : > { %1281 = vset.pattern.permute.xlu2 %v1382_v0  ;;  %v258_v7 = vld [vmem:[%s1497_s23 + $0x48] sm:$0xff]  ;;  %v622_v8 = vpack.c.bf16 %v1109_v5, %v1108_v3  ;;  %v1106_v9 = vld [vmem:[%s1497_s23 + $0xa0] sm:$0xff]  ;;  %v255_v13 = vld [vmem:[%s1497_s23 + $0x30] sm:$0xff]  ;;  %s968_s16 = scalar_lea.hbm %s1783_s5, %s1196_s12  ;;  %s956_s22 = scalar_lea.sflag [#allocation4], %s1493_s11 }
  0x2d   : > { %v1107_v10 = vld [vmem:[%s1497_s23 + $0xa8] sm:$0xff]  ;;  %292 = vmatpush.bf16.msra.mxu0 %v266_v4  ;;  %v265_v11 = vpack.c.bf16 %v258_v7, %v257_v6  ;;  %v256_v14 = vld [vmem:[%s1497_s23 + $0x38] sm:$0xff]  ;;  %v1104_v15 = vld [vmem:[%s1497_s23 + $0x90] sm:$0xff]  ;;  %s971_s26 = sshll.u32 %s968_s16, 4  ;;  %s972_s26 = int_to_ptr.hbm [resolvable:$true] %s971_s26 }
  0x2e   : > { %647 = vmatpush.bf16.msra.mxu2 %v622_v8  ;;  %v621_v12 = vpack.c.bf16 %v1107_v10, %v1106_v9  ;;  %v1105_v16 = vld [vmem:[%s1497_s23 + $0x98] sm:$0xff]  ;;  %v264_v17 = vpack.c.bf16 %v256_v14, %v255_v13  ;;  %v253_v19 = vld [vmem:[%s1497_s23 + $0x20] sm:$0xff]  ;;  %v254_v20 = vld [vmem:[%s1497_s23 + $0x28] sm:$0xff]  ;;  %s1326_s7 = sshra.s32 %s972_s26, 4  ;;  %s1327_s7 = int_to_ptr.hbm [resolvable:$true] %s1326_s7 }
  0x2f   : > { %v620_v18 = vpack.c.bf16 %v1105_v16, %v1104_v15  ;;  %v269_v21 = vld [vmem:[%s1780_s2] sm:$0xff]  ;;  %v1103_v23 = vld [vmem:[%s1497_s23 + $0x88] sm:$0xff]  ;;  %v263_v24 = vpack.c.bf16 %v254_v20, %v253_v19  ;;  %v251_v26 = vld [vmem:[%s1497_s23 + $0x10] sm:$0xff]  ;;  %p1333_p3 = scmp.lt.s32.totalorder %s1327_s7, %s1783_s5 }
  0x30   : > { %v1102_v22 = vld [vmem:[%s1497_s23 + $0x80] sm:$0xff]  ;;  %273 = vperm.xlu1 %1260, %v269_v21   ;;  %629 = vperm.xlu0 %1259, %v269_v21   ;;  %v252_v27 = vld [vmem:[%s1497_s23 + $0x18] sm:$0xff]  ;;  %v1100_v28 = vld [vmem:[%s1497_s23 + $0x70] sm:$0xff]  ;;  %v306_v21 = vlaneseq }
  0x31   : > { %293 = vmatpush.bf16.msra.mxu0 %v265_v11  ;;  %v619_v25 = vpack.c.bf16 %v1103_v23, %v1102_v22  ;;  %v1101_v29 = vld [vmem:[%s1497_s23 + $0x78] sm:$0xff]  ;;  %v270_v30 = vld [vmem:[%s1780_s2 + $0x8] sm:$0xff]  ;;  %v262_v31 = vpack.c.bf16 %v252_v27, %v251_v26  ;;  %v249_v33 = vld [vmem:[%s1497_s23] sm:$0xff] }
  0x32   : > { %648 = vmatpush.bf16.msra.mxu2 %v621_v12  ;;  %v618_v32 = vpack.c.bf16 %v1101_v29, %v1100_v28  ;;  %v250_v34 = vld [vmem:[%s1497_s23 + $0x8] sm:$0xff]  ;;  %v1098_v35 = vld [vmem:[%s1497_s23 + $0x60] sm:$0xff]  ;;  %v364_v1 = vld [vmem:[%s1782_s4 + $0x10] sm:$0xff]  ;;  %v307_v22 = vand.u32 127, %v306_v21 }
  0x33   : > { %v1099_v36 = vld [vmem:[%s1497_s23 + $0x68] sm:$0xff]  ;;  %v261_v37 = vpack.c.bf16 %v250_v34, %v249_v33  ;;  %v1177_v39 = vld [vmem:[%s1779_s1] sm:$0xff]  ;;  %v369_v10 = vld [vmem:[%s1782_s4 + $0x38] sm:$0xff]  ;;  %s1052_s23 = sshll.u32 %s1493_s11, 8 }
  0x34   : > { %v617_v38 = vpack.c.bf16 %v1099_v36, %v1098_v35  ;;  %v1186_v40 = vld [vmem:[%s1779_s1] sm:$0xff]  ;;  %v363_v2 = vld [vmem:[%s1782_s4 + $0x8] sm:$0xff]  ;;  %v373_v12 = vld [vmem:[%s1782_s4 + $0x58] sm:$0xff]  ;;  %vm319_vm1 = vcmp.eq.s32.totalorder %v307_v22, 127  ;;  %vm310_vm2 = vcmp.eq.s32.totalorder %v307_v22, 0  ;;  %s1696_s28 = scalar_lea.vmem [#allocation5], %s1052_s23 }
  0x35   : > { %294 = vmatpush.bf16.msra.mxu0 %v264_v17  ;;  %v367_v7 = vld [vmem:[%s1782_s4 + $0x28] sm:$0xff]  ;;  %v366_v8 = vld [vmem:[%s1782_s4 + $0x20] sm:$0xff]  ;;  %v372_v13 = vld [vmem:[%s1782_s4 + $0x50] sm:$0xff]  ;;  %s969_s25 = sshll.u32 %s1696_s28, 4  ;;  %s970_s25 = int_to_ptr.vmem [resolvable:$true] %s969_s25 }
  0x36   : > { %649 = vmatpush.bf16.msra.mxu2 %v620_v18  ;;  %v370_v9 = vld [vmem:[%s1782_s4 + $0x40] sm:$0xff]  ;;  %v716_v14 = vld [vmem:[%s1782_s4 + $0x18] sm:$0xff]  ;;  %v376_v15 = vld [vmem:[%s1782_s4 + $0x70] sm:$0xff] }
  0x37   : > { %v713_v11 = vld [vmem:[%s1782_s4] sm:$0xff]  ;;  %v375_v16 = vld [vmem:[%s1782_s4 + $0x68] sm:$0xff]  ;;  %v719_v17 = vld [vmem:[%s1782_s4 + $0x30] sm:$0xff] }
  0x38   : > { %278 = vperm.xlu1 %1260, %v270_v30   ;;  %634 = vperm.xlu0 %1259, %v270_v30   ;;  %v722_v18 = vld [vmem:[%s1782_s4 + $0x48] sm:$0xff]  ;;  %v725_v19 = vld [vmem:[%s1782_s4 + $0x60] sm:$0xff]  ;;  %v728_v20 = vld [vmem:[%s1782_s4 + $0x78] sm:$0xff] }
  0x39   : > { %295 = vmatpush.bf16.msra.mxu0 %v263_v24 }
  0x3a   : > { %650 = vmatpush.bf16.msra.mxu2 %v619_v25 }
  0x3d   : > { %296 = vmatpush.bf16.msra.mxu0 %v262_v31 }
  0x3e   : > { %651 = vmatpush.bf16.msra.mxu2 %v618_v32 }
  0x41   : > { %297 = vmatpush.bf16.msra.mxu0 %v261_v37 }
  0x42   : > { %652 = vmatpush.bf16.msra.mxu2 %v617_v38 }
  0x44   : > { %1057 = vmatmul.msk.bf16.vlgmr.msra.gmra.mxu0 %vm286_vm0, %v1177_v39 }
  0x45   : > { %1114 = vmatmul.msk.bf16.vlgmr.msra.gmra.mxu2 %vm286_vm0, %v1186_v40 }
  0xa2   : > { %v274_v41 = vpop.permute.xlu1 %273  ;;  %v630_v44 = vpop.permute.xlu0 %629 }
  0xaa   : > { %v279_v47 = vpop.permute.xlu1 %278  ;;  %v635_v54 = vpop.permute.xlu0 %634 }
  0xc1   : > { %v299_v42 = vpop.f32.mrf.mxu0 }
  0xc2   : > { %v300_v43 = vadd.f32 %v299_v42, %v274_v41 }
  0xc4   : > { %v304_v45 = vmax.f32 %v300_v43, 0.0 }
  0xc6   : > { %v308_v52 = vpack.c.bf16 %v304_v45, %v304_v45 }
  0xc8   : > { %v654_v46 = vpop.f32.mrf.mxu2  ;;  %v330_v58 = vunpack.c.l.b16 %v308_v52 }
  0xc9   : > { %v655_v48 = vadd.f32 %v654_v46, %v630_v44  ;;  %v301_v49 = vpop.f32.mrf.mxu0 }
  0xca   : > { %v302_v50 = vadd.f32 %v301_v49, %v279_v47 }
  0xcb   : > { %v659_v53 = vmax.f32 %v655_v48, 0.0 }
  0xcc   : > { %v305_v51 = vmax.f32 %v302_v50, 0.0 }
  0xcd   : > { %v661_v61 = vpack.c.bf16 %v659_v53, %v659_v53 }
  0xce   : > { %v1276_v55 = vpack.i.bf16 %v305_v51, %v304_v45  ;;  %v309_v56 = vpack.c.bf16 %v305_v51, %v305_v51 }
  0xcf   : > { %v681_v4 = vunpack.c.l.b16 %v661_v61 }
  0xd0   : > { %v656_v57 = vpop.f32.mrf.mxu2  ;;  %1277 = vrot.lane.b32.xlu1 %v1276_v55, %s1383_s9  ;;  %1272 = vrot.lane.b32.xlu0 %v1276_v55, %s1384_s10  ;;  %v331_v59 = vunpack.c.l.b16 %v309_v56 }
  0xd1   : > { %v657_v60 = vadd.f32 %v656_v57, %v635_v54  ;;  %v1190_v54 = vld [vmem:[%s1781_s3 + $0x18] sm:$0xff] }
  0xd2   : > { %v1539_v62 = vpack.c.b16 %v331_v59, %v330_v58 }
  0xd3   : > { %v660_v63 = vmax.f32 %v657_v60, 0.0 }
  0xd5   : > { %v1261_v0 = vpack.i.bf16 %v660_v63, %v659_v53  ;;  %v662_v3 = vpack.c.bf16 %v660_v63, %v660_v63  ;;  %v1187_v53 = vld [vmem:[%s1781_s3] sm:$0xff] }
  0xd7   : > { %1262 = vrot.lane.b32.xlu2 %v1261_v0, %s1384_s10  ;;  %v682_v5 = vunpack.c.l.b16 %v662_v3  ;;  %v1181_v3 = vld [vmem:[%s1781_s3 + $0x18] sm:$0xff]  ;;  %s1328_s10 = scalar_lea.hbm %s1327_s7, 256 }
  0xd8   : > { %390 = vperm.xlu1 %1260, %v364_v1   ;;  %385 = vperm.xlu0 %1259, %v363_v2   ;;  %p1329_p6 = scmp.ne.s32.totalorder %s1327_s7, %s1328_s10 }
  0xd9   : > { %v1547_v6 = vpack.c.b16 %v682_v5, %v681_v4  ;;  %v1188_v4 = vld [vmem:[%s1781_s3 + $0x8] sm:$0xff]  ;;  %v1191_v5 = vld [vmem:[%s1781_s3 + $0x20] sm:$0xff] }
  0xda   : > { %p1330_p13 = pnand %p1329_p6, %p1463_p11 }
  0xdc   : > { %p1331_p2 = pneg %p1330_p13 }
  0xdf   : > { %1267 = vrot.lane.b32.xlu2 %v1261_v0, %s1383_s9  ;;  %s1332_s9 = scalar_lea.hbm %s1783_s5, 512 }
  0xe0   : > { %405 = vperm.xlu1 %1260, %v367_v7   ;;  %400 = vperm.xlu0 %1259, %v366_v8   ;;  %p1334_p4 = scmp.lt.s32.totalorder %s1332_s9, %s1328_s10 }
  0xe2   : > { %p1335_p5 = por %p1334_p4, %p1333_p3 }
  0xe4   : > { %p1336_p7 = pnand %p1335_p5, %p1331_p2 }
  0xe7   : > { %380 = vperm.xlu2 %1281, %v713_v11  }
  0xe8   : > { %420 = vperm.xlu1 %1260, %v370_v9   ;;  %415 = vperm.xlu0 %1259, %v369_v10  }
  0xef   : > { %395 = vperm.xlu2 %1281, %v716_v14  }
  0xf0   : > { %435 = vperm.xlu1 %1260, %v373_v12   ;;  %430 = vperm.xlu0 %1259, %v372_v13  }
  0xf7   : > { %410 = vperm.xlu2 %1281, %v719_v17  }
  0xf8   : > { %450 = vperm.xlu1 %1260, %v376_v15   ;;  %445 = vperm.xlu0 %1259, %v375_v16  }
  0xff   : > { %425 = vperm.xlu2 %1281, %v722_v18  }
 0x100   : > { %736 = vperm.xlu1 %1260, %v363_v2   ;;  %731 = vperm.xlu0 %1259, %v713_v11   ;;  %v1178_v2 = vld [vmem:[%s1781_s3] sm:$0xff]  ;;  %v1193_v11 = vld [vmem:[%s1781_s3 + $0x30] sm:$0xff] }
 0x107   : > { %440 = vperm.xlu2 %1281, %v725_v19  }
 0x108   : > { %751 = vperm.xlu1 %1260, %v366_v8   ;;  %746 = vperm.xlu0 %1259, %v716_v14   ;;  %v1192_v8 = vld [vmem:[%s1781_s3 + $0x28] sm:$0xff]  ;;  %v1194_v14 = vld [vmem:[%s1781_s3 + $0x38] sm:$0xff] }
 0x10f   : > { %455 = vperm.xlu2 %1281, %v728_v20  }
 0x110   : > { %766 = vperm.xlu1 %1260, %v369_v10   ;;  %761 = vperm.xlu0 %1259, %v719_v17   ;;  %v1183_v10 = vld [vmem:[%s1781_s3 + $0x28] sm:$0xff] }
 0x117   : > { %741 = vperm.xlu2 %1281, %v364_v1  }
 0x118   : > { %781 = vperm.xlu1 %1260, %v372_v13   ;;  %776 = vperm.xlu0 %1259, %v722_v18   ;;  %v1185_v18 = vld [vmem:[%s1781_s3 + $0x38] sm:$0xff] }
 0x11f   : > { %756 = vperm.xlu2 %1281, %v367_v7   ;;  %v1189_v7 = vld [vmem:[%s1781_s3 + $0x10] sm:$0xff] }
 0x120   : > { %796 = vperm.xlu1 %1260, %v375_v16   ;;  %791 = vperm.xlu0 %1259, %v725_v19  }
 0x127   : > { %771 = vperm.xlu2 %1281, %v370_v9   ;;  %v1180_v9 = vld [vmem:[%s1781_s3 + $0x10] sm:$0xff] }
 0x128   : > { %806 = vperm.xlu0 %1259, %v728_v20  }
 0x12f   : > { %786 = vperm.xlu2 %1281, %v373_v12   ;;  %v1184_v12 = vld [vmem:[%s1781_s3 + $0x30] sm:$0xff] }
 0x131   : > { %v1263_v23 = vpop.permute.xlu2 %1262 }
 0x132   : > { %v1265_v24 = vunpack.i.h.bf16 %v1263_v23  ;;  %v1264_v25 = vunpack.i.l.bf16 %v1263_v23 }
 0x134   : > { %v676_v26 = vsel %vm319_vm1, 0.0, %v1265_v24  ;;  %v675_v27 = vsel %vm319_vm1, 0.0, %v1264_v25 }
 0x135   : > { %v677_v28 = vpack.c.bf16 %v675_v27, %v675_v27  ;;  %v678_v29 = vpack.c.bf16 %v676_v26, %v676_v26 }
 0x137   : > { %v693_v30 = vunpack.c.l.b16 %v677_v28  ;;  %v694_v31 = vunpack.c.l.b16 %v678_v29  ;;  %801 = vperm.xlu2 %1281, %v376_v15  }
 0x139   : > { %v1268_v32 = vpop.permute.xlu2 %1267  ;;  %v695_v33 = vpack.c.b16 %v694_v31, %v693_v30 }
 0x13a   : > { %v1270_v34 = vunpack.i.h.bf16 %v1268_v32  ;;  %v1269_v35 = vunpack.i.l.bf16 %v1268_v32 }
 0x13b   : > { %878 = vmatpush.bf16.msrb.mxu2 %v695_v33  ;;  %1200 = vmatpush.bf16.msra.mxu3 %v695_v33 }
 0x13c   : > { %v668_v36 = vsel %vm310_vm2, 0.0, %v1270_v34  ;;  %v667_v37 = vsel %vm310_vm2, 0.0, %v1269_v35 }
 0x13d   : > { %v669_v38 = vpack.c.bf16 %v667_v37, %v667_v37  ;;  %v670_v39 = vpack.c.bf16 %v668_v36, %v668_v36 }
 0x13f   : > { %v687_v40 = vunpack.c.l.b16 %v669_v38  ;;  %v688_v41 = vunpack.c.l.b16 %v670_v39 }
 0x141   : > { %v689_v42 = vpack.c.b16 %v688_v41, %v687_v40  ;;  %v381_v15 = vpop.permute.xlu2 %380 }
 0x142   : > { %v1278_v43 = vpop.permute.xlu1 %1277  ;;  %v1273_v44 = vpop.permute.xlu0 %1272 }
 0x143   : > { %879 = vmatpush.bf16.msrb.mxu2 %v689_v42  ;;  %1201 = vmatpush.bf16.msra.mxu3 %v689_v42  ;;  %v1280_v45 = vunpack.i.h.bf16 %v1278_v43  ;;  %v1279_v46 = vunpack.i.l.bf16 %v1278_v43  ;;  %v1275_v47 = vunpack.i.h.bf16 %v1273_v44  ;;  %v1274_v48 = vunpack.i.l.bf16 %v1273_v44 }
 0x145   : > { %v316_v49 = vsel %vm310_vm2, 0.0, %v1280_v45  ;;  %v315_v50 = vsel %vm310_vm2, 0.0, %v1279_v46  ;;  %v325_v51 = vsel %vm319_vm1, 0.0, %v1275_v47  ;;  %v324_v52 = vsel %vm319_vm1, 0.0, %v1274_v48 }
 0x146   : > { %v326_v55 = vpack.c.bf16 %v324_v52, %v324_v52  ;;  %v327_v56 = vpack.c.bf16 %v325_v51, %v325_v51  ;;  %v317_v57 = vpack.c.bf16 %v315_v50, %v315_v50  ;;  %v318_v58 = vpack.c.bf16 %v316_v49, %v316_v49 }
 0x147   : > { %880 = vmatpush.bf16.msrb.mxu2 %v1547_v6  ;;  %1202 = vmatpush.bf16.msra.mxu3 %v1547_v6  ;;  %v1182_v6 = vld [vmem:[%s1781_s3 + $0x20] sm:$0xff] }
 0x148   : > { %v342_v59 = vunpack.c.l.b16 %v326_v55  ;;  %v343_v60 = vunpack.c.l.b16 %v327_v56  ;;  %v336_v63 = vunpack.c.l.b16 %v317_v57  ;;  %v337_v0 = vunpack.c.l.b16 %v318_v58 }
 0x149   : > { %v1670_v19 = vpop.permute.xlu2 %395 }
 0x14a   : > { %1147 = vmatmul.msk.bf16.vlgmr.msrb.gmra.mxu2 %vm498_vm3, %v1187_v53  ;;  %1150 = vmatmul.msk.bf16.vlgmr.msra.gmra.mxu3 %vm498_vm3, %v1190_v54  ;;  %v344_v61 = vpack.c.b16 %v343_v60, %v342_v59  ;;  %v338_v1 = vpack.c.b16 %v337_v0, %v336_v63  ;;  %v386_v13 = vpop.permute.xlu0 %385  ;;  %v1663_v16 = vpop.permute.xlu1 %390 }
 0x14c   : > { %528 = vmatpush.bf16.msrb.mxu0 %v344_v61  ;;  %1197 = vmatpush.bf16.msra.mxu1 %v344_v61 }
 0x150   : > { %529 = vmatpush.bf16.msrb.mxu0 %v338_v1  ;;  %1198 = vmatpush.bf16.msra.mxu1 %v338_v1 }
 0x151   : > { %v411_v22 = vpop.permute.xlu2 %410 }
 0x152   : > { %v1665_v17 = vpop.permute.xlu0 %400  ;;  %v1672_v20 = vpop.permute.xlu1 %405 }
 0x154   : > { %530 = vmatpush.bf16.msrb.mxu0 %v1539_v62  ;;  %1199 = vmatpush.bf16.msra.mxu1 %v1539_v62  ;;  %v1179_v62 = vld [vmem:[%s1781_s3 + $0x8] sm:$0xff] }
 0x157   : > { %1090 = vmatmul.msk.bf16.vlgmr.msrb.gmra.mxu0 %vm498_vm3, %v1178_v2  ;;  %1093 = vmatmul.msk.bf16.vlgmr.msra.gmra.mxu1 %vm498_vm3, %v1181_v3 }
 0x159   : > { %v1679_v25 = vpop.permute.xlu2 %425 }
 0x15a   : > { %1148 = vmatmul.msk.bf16.gmra.mxu2 %vm498_vm3, %v1188_v4  ;;  %1151 = vmatmul.msk.bf16.gmra.mxu3 %vm498_vm3, %v1191_v5  ;;  %v416_v21 = vpop.permute.xlu0 %415  ;;  %v1675_v23 = vpop.permute.xlu1 %420 }
 0x161   : > { %v1685_v28 = vpop.permute.xlu2 %440 }
 0x162   : > { %v1677_v24 = vpop.permute.xlu0 %430  ;;  %v1681_v26 = vpop.permute.xlu1 %435 }
 0x167   : > { %1091 = vmatmul.msk.bf16.gmra.mxu0 %vm498_vm3, %v1179_v62  ;;  %1094 = vmatmul.msk.bf16.gmra.mxu1 %vm498_vm3, %v1182_v6 }
 0x169   : > { %v1689_v31 = vpop.permute.xlu2 %455 }
 0x16a   : > { %1149 = vmatmul.msk.bf16.gmra.mxu2 %vm498_vm3, %v1189_v7  ;;  %1152 = vmatmul.msk.bf16.gmra.mxu3 %vm498_vm3, %v1192_v8  ;;  %v1683_v27 = vpop.permute.xlu0 %445  ;;  %v1687_v29 = vpop.permute.xlu1 %450 }
 0x171   : > { %v742_v34 = vpop.permute.xlu2 %741 }
 0x172   : > { %v732_v30 = vpop.permute.xlu0 %731  ;;  %v737_v32 = vpop.permute.xlu1 %736 }
 0x177   : > { %1092 = vmatmul.msk.bf16.gmra.mxu0 %vm498_vm3, %v1180_v9  ;;  %1095 = vmatmul.msk.bf16.gmra.mxu1 %vm498_vm3, %v1183_v10 }
 0x179   : > { %v1694_v43 = vpop.permute.xlu2 %756 }
 0x17a   : > { %1153 = vmatmul.msk.bf16.gmra.mxu3 %vm498_vm3, %v1193_v11  ;;  %v747_v33 = vpop.permute.xlu0 %746  ;;  %v1691_v35 = vpop.permute.xlu1 %751 }
 0x181   : > { %v772_v57 = vpop.permute.xlu2 %771 }
 0x182   : > { %v762_v36 = vpop.permute.xlu0 %761  ;;  %v767_v44 = vpop.permute.xlu1 %766 }
 0x187   : > { %1096 = vmatmul.msk.bf16.gmra.mxu1 %vm498_vm3, %v1184_v12 }
 0x18a   : > { %1154 = vmatmul.msk.bf16.gmra.mxu3 %vm498_vm3, %v1194_v14  ;;  %v777_v6 = vpop.permute.xlu0 %776 }
 0x197   : > { %1097 = vmatmul.msk.bf16.gmra.mxu1 %vm498_vm3, %v1185_v18 }
 0x1cd   : > { %v882_v37 = vpop.f32.mrf.mxu2  ;;  %v897_v38 = vpop.f32.mrf.mxu3 }
 0x1ce   : > { %v883_v39 = vadd.f32 %v882_v37, %v732_v30  ;;  %v898_v40 = vadd.f32 %v897_v38, %v762_v36  ;;  %v782_v30 = vpop.permute.xlu1 %781 }
 0x1d0   : > { %v922_v41 = vmax.f32 %v883_v39, 0.0  ;;  %v928_v42 = vmax.f32 %v898_v40, 0.0 }
 0x1d2   : > { %1155 = vst [vmem:[%s1696_s28 + $0x80] sm:$0xff] %v922_v41 }
 0x1d3   : > { %1161 = vst [vmem:[%s1696_s28 + $0xb0] sm:$0xff] %v928_v42 }
 0x1d4   : > { %v532_v45 = vpop.f32.mrf.mxu0  ;;  %v547_v46 = vpop.f32.mrf.mxu1 }
 0x1d5   : > { %v533_v47 = vadd.f32 %v532_v45, %v381_v15  ;;  %v548_v48 = vadd.f32 %v547_v46, %v411_v22  ;;  %v884_v49 = vpop.f32.mrf.mxu2  ;;  %v899_v50 = vpop.f32.mrf.mxu3 }
 0x1d6   : > { %v885_v51 = vadd.f32 %v884_v49, %v737_v32  ;;  %v900_v52 = vadd.f32 %v899_v50, %v767_v44  ;;  %v787_v44 = vpop.permute.xlu2 %786 }
 0x1d7   : > { %v572_v53 = vmax.f32 %v533_v47, 0.0  ;;  %v578_v54 = vmax.f32 %v548_v48, 0.0 }
 0x1d8   : > { %v923_v55 = vmax.f32 %v885_v51, 0.0  ;;  %v929_v56 = vmax.f32 %v900_v52, 0.0 }
 0x1d9   : > { %588 = vst [vmem:[%s1696_s28] sm:$0xff] %v572_v53 }
 0x1da   : > { %594 = vst [vmem:[%s1696_s28 + $0x30] sm:$0xff] %v578_v54 }
 0x1db   : > { %1156 = vst [vmem:[%s1696_s28 + $0x88] sm:$0xff] %v923_v55  ;;  %v792_v55 = vpop.permute.xlu0 %791 }
 0x1dc   : > { %1162 = vst [vmem:[%s1696_s28 + $0xb8] sm:$0xff] %v929_v56  ;;  %v534_v58 = vpop.f32.mrf.mxu0  ;;  %v549_v59 = vpop.f32.mrf.mxu1 }
 0x1dd   : > { %v535_v60 = vadd.f32 %v534_v58, %v386_v13  ;;  %v550_v61 = vadd.f32 %v549_v59, %v416_v21  ;;  %v887_v63 = vpop.f32.mrf.mxu2  ;;  %v902_v0 = vpop.f32.mrf.mxu3 }
 0x1de   : > { %v888_v1 = vadd.f32 %v887_v63, %v742_v34  ;;  %v903_v2 = vadd.f32 %v902_v0, %v772_v57  ;;  %v797_v63 = vpop.permute.xlu1 %796 }
 0x1df   : > { %v573_v3 = vmax.f32 %v535_v60, 0.0  ;;  %v579_v4 = vmax.f32 %v550_v61, 0.0 }
 0x1e0   : > { %v924_v5 = vmax.f32 %v888_v1, 0.0  ;;  %v930_v62 = vmax.f32 %v903_v2, 0.0 }
 0x1e1   : > { %589 = vst [vmem:[%s1696_s28 + $0x8] sm:$0xff] %v573_v3 }
 0x1e2   : > { %595 = vst [vmem:[%s1696_s28 + $0x38] sm:$0xff] %v579_v4  ;;  %v802_v4 = vpop.permute.xlu2 %801 }
 0x1e3   : > { %1157 = vst [vmem:[%s1696_s28 + $0x90] sm:$0xff] %v924_v5 }
 0x1e4   : > { %1163 = vst [vmem:[%s1696_s28 + $0xc0] sm:$0xff] %v930_v62  ;;  %v537_v7 = vpop.f32.mrf.mxu0  ;;  %v552_v8 = vpop.f32.mrf.mxu1 }
 0x1e5   : > { %v538_v9 = vadd.f32 %v537_v7, %v1663_v16  ;;  %v553_v10 = vadd.f32 %v552_v8, %v1675_v23  ;;  %v889_v11 = vpop.f32.mrf.mxu2  ;;  %v904_v12 = vpop.f32.mrf.mxu3 }
 0x1e6   : > { %v890_v13 = vadd.f32 %v889_v11, %v747_v33  ;;  %v905_v14 = vadd.f32 %v904_v12, %v777_v6 }
 0x1e7   : > { %v574_v15 = vmax.f32 %v538_v9, 0.0  ;;  %v580_v18 = vmax.f32 %v553_v10, 0.0  ;;  %v807_v9 = vpop.permute.xlu0 %806 }
 0x1e8   : > { %v925_v21 = vmax.f32 %v890_v13, 0.0  ;;  %v931_v22 = vmax.f32 %v905_v14, 0.0 }
 0x1e9   : > { %590 = vst [vmem:[%s1696_s28 + $0x10] sm:$0xff] %v574_v15 }
 0x1ea   : > { %596 = vst [vmem:[%s1696_s28 + $0x40] sm:$0xff] %v580_v18 }
 0x1eb   : > { %1158 = vst [vmem:[%s1696_s28 + $0x98] sm:$0xff] %v925_v21 }
 0x1ec   : > { %1164 = vst [vmem:[%s1696_s28 + $0xc8] sm:$0xff] %v931_v22  ;;  %v539_v32 = vpop.f32.mrf.mxu0  ;;  %v554_v16 = vpop.f32.mrf.mxu1 }
 0x1ed   : > { %v540_v23 = vadd.f32 %v539_v32, %v1670_v19  ;;  %v555_v33 = vadd.f32 %v554_v16, %v1679_v25  ;;  %v892_v34 = vpop.f32.mrf.mxu2  ;;  %v907_v36 = vpop.f32.mrf.mxu3 }
 0x1ee   : > { %v893_v37 = vadd.f32 %v892_v34, %v1691_v35  ;;  %v908_v38 = vadd.f32 %v907_v36, %v782_v30 }
 0x1ef   : > { %v575_v39 = vmax.f32 %v540_v23, 0.0  ;;  %v581_v40 = vmax.f32 %v555_v33, 0.0 }
 0x1f0   : > { %v926_v41 = vmax.f32 %v893_v37, 0.0  ;;  %v932_v42 = vmax.f32 %v908_v38, 0.0 }
 0x1f1   : > { %591 = vst [vmem:[%s1696_s28 + $0x18] sm:$0xff] %v575_v39 }
 0x1f2   : > { %597 = vst [vmem:[%s1696_s28 + $0x48] sm:$0xff] %v581_v40 }
 0x1f3   : > { %1159 = vst [vmem:[%s1696_s28 + $0xa0] sm:$0xff] %v926_v41 }
 0x1f4   : > { %1165 = vst [vmem:[%s1696_s28 + $0xd0] sm:$0xff] %v932_v42  ;;  %v542_v19 = vpop.f32.mrf.mxu0  ;;  %v557_v25 = vpop.f32.mrf.mxu1 }
 0x1f5   : > { %v543_v45 = vadd.f32 %v542_v19, %v1665_v17  ;;  %v558_v35 = vadd.f32 %v557_v25, %v1677_v24  ;;  %v894_v46 = vpop.f32.mrf.mxu2  ;;  %v909_v47 = vpop.f32.mrf.mxu3 }
 0x1f6   : > { %v895_v48 = vadd.f32 %v894_v46, %v1694_v43  ;;  %v910_v49 = vadd.f32 %v909_v47, %v787_v44 }
 0x1f7   : > { %v576_v50 = vmax.f32 %v543_v45, 0.0  ;;  %v582_v51 = vmax.f32 %v558_v35, 0.0 }
 0x1f8   : > { %v927_v52 = vmax.f32 %v895_v48, 0.0  ;;  %v933_v53 = vmax.f32 %v910_v49, 0.0 }
 0x1f9   : > { %592 = vst [vmem:[%s1696_s28 + $0x20] sm:$0xff] %v576_v50 }
 0x1fa   : > { %598 = vst [vmem:[%s1696_s28 + $0x50] sm:$0xff] %v582_v51 }
 0x1fb   : > { %1160 = vst [vmem:[%s1696_s28 + $0xa8] sm:$0xff] %v927_v52 }
 0x1fc   : > { %1166 = vst [vmem:[%s1696_s28 + $0xd8] sm:$0xff] %v933_v53  ;;  %v544_v54 = vpop.f32.mrf.mxu0  ;;  %v559_v17 = vpop.f32.mrf.mxu1 }
 0x1fd   : > { %v545_v24 = vadd.f32 %v544_v54, %v1672_v20  ;;  %v560_v56 = vadd.f32 %v559_v17, %v1681_v26  ;;  %v912_v43 = vpop.f32.mrf.mxu3 }
 0x1fe   : > { %v913_v57 = vadd.f32 %v912_v43, %v792_v55 }
 0x1ff   : > { %v577_v58 = vmax.f32 %v545_v24, 0.0  ;;  %v583_v59 = vmax.f32 %v560_v56, 0.0 }
 0x200   : > { %v934_v60 = vmax.f32 %v913_v57, 0.0 }
 0x201   : > { %593 = vst [vmem:[%s1696_s28 + $0x28] sm:$0xff] %v577_v58 }
 0x202   : > { %599 = vst [vmem:[%s1696_s28 + $0x58] sm:$0xff] %v583_v59 }
 0x203   : > { %1167 = vst [vmem:[%s1696_s28 + $0xe0] sm:$0xff] %v934_v60 }
 0x204   : > { %v562_v61 = vpop.f32.mrf.mxu1 }
 0x205   : > { %v563_v0 = vadd.f32 %v562_v61, %v1685_v28  ;;  %v914_v1 = vpop.f32.mrf.mxu3 }
 0x206   : > { %v915_v20 = vadd.f32 %v914_v1, %v797_v63 }
 0x207   : > { %v584_v2 = vmax.f32 %v563_v0, 0.0 }
 0x208   : > { %v935_v26 = vmax.f32 %v915_v20, 0.0 }
 0x209   : > { %600 = vst [vmem:[%s1696_s28 + $0x60] sm:$0xff] %v584_v2 }
 0x20a   : > { %1168 = vst [vmem:[%s1696_s28 + $0xe8] sm:$0xff] %v935_v26 }
 0x20c   : > { %v564_v3 = vpop.f32.mrf.mxu1 }
 0x20d   : > { %v565_v5 = vadd.f32 %v564_v3, %v1683_v27  ;;  %v917_v62 = vpop.f32.mrf.mxu3 }
 0x20e   : > { %v918_v6 = vadd.f32 %v917_v62, %v802_v4 }
 0x20f   : > { %v585_v7 = vmax.f32 %v565_v5, 0.0 }
 0x210   : > { %v936_v8 = vmax.f32 %v918_v6, 0.0 }
 0x211   : > { %601 = vst [vmem:[%s1696_s28 + $0x68] sm:$0xff] %v585_v7 }
 0x212   : > { %1169 = vst [vmem:[%s1696_s28 + $0xf0] sm:$0xff] %v936_v8 }
 0x214   : > { %v567_v28 = vpop.f32.mrf.mxu1 }
 0x215   : > { %v568_v10 = vadd.f32 %v567_v28, %v1687_v29  ;;  %v919_v11 = vpop.f32.mrf.mxu3 }
 0x216   : > { %v920_v12 = vadd.f32 %v919_v11, %v807_v9 }
 0x217   : > { %v586_v13 = vmax.f32 %v568_v10, 0.0 }
 0x218   : > { %v937_v27 = vmax.f32 %v920_v12, 0.0 }
 0x219   : > { %602 = vst [vmem:[%s1696_s28 + $0x70] sm:$0xff] %v586_v13 }
 0x21a   : > { %1170 = vst [vmem:[%s1696_s28 + $0xf8] sm:$0xff] %v937_v27 }
 0x21c   : > { %v569_v14 = vpop.f32.mrf.mxu1 }
 0x21d   : > { %v570_v15 = vadd.f32 %v569_v14, %v1689_v31 }
 0x21f   : > { %v587_v29 = vmax.f32 %v570_v15, 0.0 }
 0x221   : > { %603 = vst [vmem:[%s1696_s28 + $0x78] sm:$0xff] %v587_v29 }
 0x222   : > { %1339 = shalt.err (!%p1336_p7)
}
 0x223   : > { %s1385_s11 = smov 128   ;;  %s1386_s23 = smov 8  }
 0x224   : > { %1208 = dma.vmem_to_hbm [thread:$0]  (%p1463_p11), %s970_s25, 4096, %s972_s26, %s956_s22, %s1385_s11, %s1385_s11, %s1386_s23  }
 0x225 PF: > { %s986_s28 = sand.u32 1, %s1366_s18   ;;  %p1215_p8 = pnand %p1047_p9, %p1467_p12 }
 0x226   : > { %s987_s12 = scalar_lea.sflag [#allocation4], %s986_s28 }
 0x227   : > { %p1216_p10 = pneg %p1215_p8 }
 0x229   : > { %1361 = dma.done.wait (%p1216_p10), %s987_s12, 4096  }
 0x22a   : > { %1363 = vsyncadd (%p1216_p10), %s987_s12, 4294963200  ;;  %p18_p0 = scmp.ge.s32.totalorder %s1442_s24, 4   ;;  %s1788_s18 = smov %s1370_s19 }
 0x22b   : > { %s1789_s19 = smov %s1374_s20  ;;  %s1790_s20 = smov %s1454_s27 }
 0x22c   : > { %s1791_s21 = smov %s1442_s24  ;;  %20 = sbr.rel (!%p18_p0) target bundleno = 5 (0x5), region = 87 }
 0x231   :  { %993 = vsyncpa [#allocation3], 1 }
 0x232   :  { %995 = vsyncpa [#allocation3 + $0x1], 1 }
 0x233   :  { %996 = vsyncpa [#allocation4], 1 }
 0x234   :  { %998 = vsyncpa [#allocation4 + $0x1], 1 }

</bundles_post_ra>
